<compile_context>
chip_gen: v7x
topology: tpu7x:2x2x1
jax: 0.10.0
libtpu: 0.0.40
codegen_flags: <defaults>
</compile_context>

<pallas_src>
import jax
import jax.numpy as jnp
from jax import lax
from jax.experimental import pallas as pl
from jax.experimental.pallas import tpu as pltpu

EPS = 1e-12


def _round_up(x, m):
    return ((x + m - 1) // m) * m


# --------------------------- sigma (spectral norm, 1 power iter) ---------------------------

def _sigma_kernel(w_ref, u_ref, inv_sigma_ref, v_ref, s2_ref):
    """grid = (2, NT): pass 0 accumulates v = W^T u, pass 1 accumulates ||W v||^2."""
    p = pl.program_id(0)          # pass index (0: v, 1: ||Wv||)
    i = pl.program_id(1)          # row-tile index
    nt = pl.num_programs(1)

    @pl.when(jnp.logical_and(p == 0, i == 0))
    def _():
        v_ref[...] = jnp.zeros_like(v_ref)

    @pl.when(p == 0)
    def _():
        # (1, TN) @ (TN, D) -> (1, D) on the MXU (no (N, D) broadcast temporaries).
        v_ref[...] += jnp.dot(u_ref[...], w_ref[...],
                              preferred_element_type=jnp.float32)

    @pl.when(jnp.logical_and(p == 1, i == 0))
    def _():
        # pass 0 is complete: normalize v once, reset the sigma^2 accumulator.
        v = v_ref[...]
        vn = jnp.sqrt(jnp.sum(v * v, keepdims=True))
        v_ref[...] = v / jnp.maximum(vn, EPS)
        s2_ref[...] = jnp.zeros_like(s2_ref)

    @pl.when(p == 1)
    def _():
        # (W v)^T for this row tile as a lane-dense (1, TN) row: contract the D axes
        # of v (1, D) and W (TN, D) on the MXU (i.e. v @ W^T).
        wv = lax.dot_general(v_ref[...], w_ref[...],
                             dimension_numbers=(((1,), (1,)), ((), ())),
                             preferred_element_type=jnp.float32)
        s2_ref[...] += jnp.sum(wv * wv, keepdims=True)

    @pl.when(jnp.logical_and(p == 1, i == nt - 1))
    def _():
        sigma = jnp.sqrt(s2_ref[...])                 # sigma == ||W v||
        inv_sigma_ref[...] = 1.0 / jnp.maximum(sigma, EPS)


# ------------------------------------ gather + scale ------------------------------------

def _gather_kernel(idx_ref, inv_sigma_ref, w_hbm, o_ref, rows, sems):
    """One grid step gathers & scales T rows of W into one (T, D) output tile.

    Rows are fetched from HBM with per-row DMAs into a double-buffered (2, C, D)
    VMEM ring: chunk c+1's fetches are issued before waiting on chunk c.
    """
    T = o_ref.shape[0]
    C = rows.shape[1]
    n_chunks = T // C
    base = pl.program_id(0) * T
    inv_s = inv_sigma_ref[0, 0]          # scalar read (before any DMA wait)

    def start_fetch(c, slot):
        for t in range(C):
            r = idx_ref[base + c * C + t]
            pltpu.make_async_copy(w_hbm.at[r], rows.at[slot, t],
                                  sems.at[slot, t]).start()

    start_fetch(0, 0)                    # prime slot 0

    @pl.loop(0, n_chunks)
    def _(c):
        slot = c & 1

        @pl.when(c + 1 < n_chunks)       # prefetch next chunk into the other slot
        def _():
            start_fetch(c + 1, 1 - slot)

        for t in range(C):               # wait for this chunk's rows
            pltpu.make_async_copy(w_hbm.at[0], rows.at[slot, t],
                                  sems.at[slot, t]).wait()

        off = pl.multiple_of(c * C, C)
        o_ref[pl.ds(off, C), :] = rows[slot] * inv_s


# ---------------------------------------- wrapper ----------------------------------------

def sn_embedding_forward(x, weight, u):
    """x: (B, S) int32 indices; weight: (N, D) f32; u: (N,) f32 power-iter vector."""
    N, D = weight.shape
    B, S = x.shape
    L = B * S

    # ---- sigma kernel tiling over rows of W ----
    if N <= 512:
        TN = _round_up(max(N, 8), 8)     # single tile (== full padded N)
    else:
        TN = 512                         # multiple of 128 -> lane-legal (1, TN) u block
    N_pad = _round_up(N, TN)
    NT = N_pad // TN

    w_pad = weight if N_pad == N else jnp.pad(weight, ((0, N_pad - N), (0, 0)))
    u_row = u.reshape(1, N).astype(jnp.float32)
    if N_pad != N:
        u_row = jnp.pad(u_row, ((0, 0), (0, N_pad - N)))

    inv_sigma = pl.pallas_call(
        _sigma_kernel,
        out_shape=jax.ShapeDtypeStruct((1, 1), jnp.float32),
        grid_spec=pltpu.PrefetchScalarGridSpec(
            num_scalar_prefetch=0,
            grid=(2, NT),
            in_specs=[
                pl.BlockSpec((TN, D), lambda p, i: (i, 0)),   # W row tile
                pl.BlockSpec((1, TN), lambda p, i: (0, i)),   # u, lane-dense
            ],
            out_specs=pl.BlockSpec((1, 1), lambda p, i: (0, 0)),
            scratch_shapes=[
                pltpu.VMEM((1, D), jnp.float32),   # v accumulator
                pltpu.VMEM((1, 1), jnp.float32),   # ||W v||^2 accumulator
            ],
        ),
        compiler_params=pltpu.CompilerParams(
            dimension_semantics=("arbitrary", "arbitrary")),
    )(w_pad, u_row)

    # ---- gather kernel tiling over tokens ----
    C = 8                                              # rows per double-buffer slot
    T = _round_up(max(L, C), C) if L < 128 else 128    # tokens per grid step (multiple of 8)
    L_pad = _round_up(L, T)
    idx = x.reshape(L).astype(jnp.int32)
    if L_pad != L:
        idx = jnp.pad(idx, (0, L_pad - L))             # pad with valid row 0

    out = pl.pallas_call(
        _gather_kernel,
        out_shape=jax.ShapeDtypeStruct((L_pad, D), jnp.float32),
        grid_spec=pltpu.PrefetchScalarGridSpec(
            num_scalar_prefetch=1,                     # token indices -> SMEM
            grid=(L_pad // T,),
            in_specs=[
                pl.BlockSpec(memory_space=pltpu.MemorySpace.SMEM),  # 1/sigma scalar
                pl.BlockSpec(memory_space=pl.ANY),                  # W stays in HBM
            ],
            out_specs=pl.BlockSpec((T, D), lambda s, idx_ref: (s, 0)),
            scratch_shapes=[
                pltpu.VMEM((2, C, D), jnp.float32),    # gathered-row ring buffer
                pltpu.SemaphoreType.DMA((2, C)),
            ],
        ),
        compiler_params=pltpu.CompilerParams(
            dimension_semantics=("parallel",)),        # shards tokens across TCs on v7x
    )(idx, inv_sigma, w_pad)

    if L_pad != L:
        out = out[:L]
    # TODO(synk): PyTorch spectral_norm (training mode) also updates the `u` buffer
    # in place; that stateful side effect is not returned here (forward output only).
    return out.reshape(B, S, D)


# --------------------------------------- reference ---------------------------------------

def _reference(x, weight, u):
    """Pure-JAX reference identical to torch spectral_norm(Embedding) forward."""
    v = weight.T @ u
    v = v / jnp.maximum(jnp.linalg.norm(v), EPS)
    u_new = weight @ v
    u_new = u_new / jnp.maximum(jnp.linalg.norm(u_new), EPS)
    sigma = u_new @ (weight @ v)
    return (weight / sigma)[x]


if __name__ == "__main__":
    key = jax.random.PRNGKey(0)
    k_w, k_u, k_x = jax.random.split(key, 3)

    N, D = 16, 32          # num_embeddings, embedding_dim
    B, S = 2, 8            # batch, sequence of token indices

    # nn.Embedding default init: weight ~ N(0, 1)
    weight = jax.random.normal(k_w, (N, D), dtype=jnp.float32)
    # spectral_norm init: u ~ N(0, 1) then L2-normalized
    u0 = jax.random.normal(k_u, (N,), dtype=jnp.float32)
    u0 = u0 / jnp.maximum(jnp.linalg.norm(u0), EPS)
    x = jax.random.randint(k_x, (B, S), 0, N, dtype=jnp.int32)

    out = sn_embedding_forward(x, weight, u0)
    out = jax.block_until_ready(out)

    ref = _reference(x, weight, u0)
    assert out.shape == (B, S, D)
    assert jnp.allclose(out, ref, atol=1e-5, rtol=1e-5), float(jnp.max(jnp.abs(out - ref)))
    print("KERNEL_OK")
</pallas_src>

<mosaic_0001>
module attributes {stable_mosaic.version = 11 : i64} {
  func.func @_sigma_kernel(%arg0: i32, %arg1: i32, %arg2: memref<16x32xf32, #tpu.memory_space<vmem>>, %arg3: memref<1x16xf32, #tpu.memory_space<vmem>>, %arg4: memref<1x1xf32, #tpu.memory_space<vmem>>, %arg5: memref<1x32xf32, #tpu.memory_space<vmem>>, %arg6: memref<1x1xf32, #tpu.memory_space<vmem>>) attributes {dimension_semantics = [#tpu.dimension_semantics<arbitrary>, #tpu.dimension_semantics<arbitrary>], iteration_bounds = array<i64: 2, 1>, scalar_prefetch = 0 : i64, scratch_operands = 2 : i64, tpu.core_type = #tpu.core_type<tc>, window_params = [{transform_indices = @transform_0, window_bounds = array<i64: 16, 32>}, {transform_indices = @transform_1, window_bounds = array<i64: 1, 16>}, {pipeline_mode = #tpu.pipeline_mode<synchronous>, transform_indices = @transform_2, window_bounds = array<i64: 1, 1>}]} {
    %c0_i32 = arith.constant 0 : i32
    %0 = arith.cmpi eq, %arg0, %c0_i32 : i32
    %c0_i32_0 = arith.constant 0 : i32
    %1 = arith.cmpi eq, %arg1, %c0_i32_0 : i32
    %2 = arith.andi %0, %1 : i1
    %3 = arith.extui %2 : i1 to i32
    %c0_i32_1 = arith.constant 0 : i32
    %4 = arith.cmpi ne, %3, %c0_i32_1 : i32
    scf.if %4 {
      %cst = arith.constant 0.000000e+00 : f32
      %21 = vector.broadcast %cst : f32 to vector<1x32xf32>
      %c0 = arith.constant 0 : index
      %c0_11 = arith.constant 0 : index
      %22 = vector.load %arg5[%c0, %c0_11] : memref<1x32xf32, #tpu.memory_space<vmem>>, vector<1x32xf32>
      tpu.vector_store %arg5[%c0, %c0_11], %21 {strides = array<i32>} : memref<1x32xf32, #tpu.memory_space<vmem>>, vector<1x32xf32>,
    } else {
    }
    %c0_i32_2 = arith.constant 0 : i32
    %5 = arith.cmpi eq, %arg0, %c0_i32_2 : i32
    %6 = arith.extui %5 : i1 to i32
    %c0_i32_3 = arith.constant 0 : i32
    %7 = arith.cmpi ne, %6, %c0_i32_3 : i32
    scf.if %7 {
      %c0 = arith.constant 0 : index
      %c0_11 = arith.constant 0 : index
      %21 = vector.load %arg5[%c0, %c0_11] : memref<1x32xf32, #tpu.memory_space<vmem>>, vector<1x32xf32>
      %c0_12 = arith.constant 0 : index
      %c0_13 = arith.constant 0 : index
      %22 = vector.load %arg3[%c0_12, %c0_13] : memref<1x16xf32, #tpu.memory_space<vmem>>, vector<1x16xf32>
      %c0_14 = arith.constant 0 : index
      %c0_15 = arith.constant 0 : index
      %23 = vector.load %arg2[%c0_14, %c0_15] : memref<16x32xf32, #tpu.memory_space<vmem>>, vector<16x32xf32>
      %cst = arith.constant dense<0.000000e+00> : vector<1x32xf32>
      %24 = tpu.matmul %22, %23, %cst {dimension_numbers = #tpu.dot_dimension_numbers<[1], [0], [0], [1], [0, 0, 1, 1], [], []>} : vector<1x16xf32>, vector<16x32xf32>, vector<1x32xf32> -> vector<1x32xf32>
      %25 = arith.addf %21, %24 : vector<1x32xf32>
      %c0_16 = arith.constant 0 : index
      %c0_17 = arith.constant 0 : index
      %26 = vector.load %arg5[%c0_16, %c0_17] : memref<1x32xf32, #tpu.memory_space<vmem>>, vector<1x32xf32>
      tpu.vector_store %arg5[%c0_16, %c0_17], %25 {strides = array<i32>} : memref<1x32xf32, #tpu.memory_space<vmem>>, vector<1x32xf32>,
    } else {
    }
    %c1_i32 = arith.constant 1 : i32
    %8 = arith.cmpi eq, %arg0, %c1_i32 : i32
    %c0_i32_4 = arith.constant 0 : i32
    %9 = arith.cmpi eq, %arg1, %c0_i32_4 : i32
    %10 = arith.andi %8, %9 : i1
    %11 = arith.extui %10 : i1 to i32
    %c0_i32_5 = arith.constant 0 : i32
    %12 = arith.cmpi ne, %11, %c0_i32_5 : i32
    scf.if %12 {
      %c0 = arith.constant 0 : index
      %c0_11 = arith.constant 0 : index
      %21 = vector.load %arg5[%c0, %c0_11] : memref<1x32xf32, #tpu.memory_space<vmem>>, vector<1x32xf32>
      %22 = arith.mulf %21, %21 : vector<1x32xf32>
      %23 = vector.shape_cast %22 : vector<1x32xf32> to vector<1x1x32xf32>
      %cst = arith.constant dense<0.000000e+00> : vector<1xf32>
      %24 = vector.multi_reduction <add>, %23, %cst [1, 2] : vector<1x1x32xf32> to vector<1xf32>
      %25 = vector.shape_cast %24 : vector<1xf32> to vector<1x1x1xf32>
      %26 = vector.extract %25[0, 0, 0] : f32 from vector<1x1x1xf32>
      %27 = vector.broadcast %26 : f32 to vector<1x1xf32>
      %28 = math.sqrt %27 : vector<1x1xf32>
      %cst_12 = arith.constant 9.99999996E-13 : f32
      %29 = vector.broadcast %cst_12 : f32 to vector<1x1xf32>
      %30 = arith.maximumf %28, %29 : vector<1x1xf32>
      %31 = vector.broadcast %30 : vector<1x1xf32> to vector<1x32xf32>
      %32 = arith.divf %21, %31 : vector<1x32xf32>
      %c0_13 = arith.constant 0 : index
      %c0_14 = arith.constant 0 : index
      %33 = vector.load %arg5[%c0_13, %c0_14] : memref<1x32xf32, #tpu.memory_space<vmem>>, vector<1x32xf32>
      tpu.vector_store %arg5[%c0_13, %c0_14], %32 {strides = array<i32>} : memref<1x32xf32, #tpu.memory_space<vmem>>, vector<1x32xf32>,
      %cst_15 = arith.constant 0.000000e+00 : f32
      %34 = vector.broadcast %cst_15 : f32 to vector<1x1xf32>
      %c0_16 = arith.constant 0 : index
      %c0_17 = arith.constant 0 : index
      %35 = vector.load %arg6[%c0_16, %c0_17] : memref<1x1xf32, #tpu.memory_space<vmem>>, vector<1x1xf32>
      tpu.vector_store %arg6[%c0_16, %c0_17], %34 {strides = array<i32>} : memref<1x1xf32, #tpu.memory_space<vmem>>, vector<1x1xf32>,
    } else {
    }
    %c1_i32_6 = arith.constant 1 : i32
    %13 = arith.cmpi eq, %arg0, %c1_i32_6 : i32
    %14 = arith.extui %13 : i1 to i32
    %c0_i32_7 = arith.constant 0 : i32
    %15 = arith.cmpi ne, %14, %c0_i32_7 : i32
    scf.if %15 {
      %c0 = arith.constant 0 : index
      %c0_11 = arith.constant 0 : index
      %21 = vector.load %arg5[%c0, %c0_11] : memref<1x32xf32, #tpu.memory_space<vmem>>, vector<1x32xf32>
      %c0_12 = arith.constant 0 : index
      %c0_13 = arith.constant 0 : index
      %22 = vector.load %arg2[%c0_12, %c0_13] : memref<16x32xf32, #tpu.memory_space<vmem>>, vector<16x32xf32>
      %cst = arith.constant dense<0.000000e+00> : vector<1x16xf32>
      %23 = tpu.matmul %21, %22, %cst {dimension_numbers = #tpu.dot_dimension_numbers<[1], [1], [0], [0], [0, 0, 1, 0], [], []>} : vector<1x32xf32>, vector<16x32xf32>, vector<1x16xf32> -> vector<1x16xf32>
      %c0_14 = arith.constant 0 : index
      %c0_15 = arith.constant 0 : index
      %24 = vector.load %arg6[%c0_14, %c0_15] : memref<1x1xf32, #tpu.memory_space<vmem>>, vector<1x1xf32>
      %25 = arith.mulf %23, %23 : vector<1x16xf32>
      %26 = vector.shape_cast %25 : vector<1x16xf32> to vector<1x1x16xf32>
      %cst_16 = arith.constant dense<0.000000e+00> : vector<1xf32>
      %27 = vector.multi_reduction <add>, %26, %cst_16 [1, 2] : vector<1x1x16xf32> to vector<1xf32>
      %28 = vector.shape_cast %27 : vector<1xf32> to vector<1x1x1xf32>
      %29 = vector.extract %28[0, 0, 0] : f32 from vector<1x1x1xf32>
      %30 = vector.broadcast %29 : f32 to vector<1x1xf32>
      %31 = arith.addf %24, %30 : vector<1x1xf32>
      %c0_17 = arith.constant 0 : index
      %c0_18 = arith.constant 0 : index
      %32 = vector.load %arg6[%c0_17, %c0_18] : memref<1x1xf32, #tpu.memory_space<vmem>>, vector<1x1xf32>
      tpu.vector_store %arg6[%c0_17, %c0_18], %31 {strides = array<i32>} : memref<1x1xf32, #tpu.memory_space<vmem>>, vector<1x1xf32>,
    } else {
    }
    %c1_i32_8 = arith.constant 1 : i32
    %16 = arith.cmpi eq, %arg0, %c1_i32_8 : i32
    %c0_i32_9 = arith.constant 0 : i32
    %17 = arith.cmpi eq, %arg1, %c0_i32_9 : i32
    %18 = arith.andi %16, %17 : i1
    %19 = arith.extui %18 : i1 to i32
    %c0_i32_10 = arith.constant 0 : i32
    %20 = arith.cmpi ne, %19, %c0_i32_10 : i32
    scf.if %20 {
      %c0 = arith.constant 0 : index
      %c0_11 = arith.constant 0 : index
      %21 = vector.load %arg6[%c0, %c0_11] : memref<1x1xf32, #tpu.memory_space<vmem>>, vector<1x1xf32>
      %22 = math.sqrt %21 : vector<1x1xf32>
      %cst = arith.constant 9.99999996E-13 : f32
      %23 = vector.broadcast %cst : f32 to vector<1x1xf32>
      %24 = arith.maximumf %22, %23 : vector<1x1xf32>
      %cst_12 = arith.constant 1.000000e+00 : f32
      %25 = vector.broadcast %cst_12 : f32 to vector<1x1xf32>
      %26 = arith.divf %25, %24 : vector<1x1xf32>
      %c0_13 = arith.constant 0 : index
      %c0_14 = arith.constant 0 : index
      %27 = vector.load %arg4[%c0_13, %c0_14] : memref<1x1xf32, #tpu.memory_space<vmem>>, vector<1x1xf32>
      tpu.vector_store %arg4[%c0_13, %c0_14], %26 {strides = array<i32>} : memref<1x1xf32, #tpu.memory_space<vmem>>, vector<1x1xf32>,
    } else {
    }
    return
  }
  func.func @transform_0(%arg0: i32, %arg1: i32) -> (i32, i32) {
    %c0_i32 = arith.constant 0 : i32
    %c0_i32_0 = arith.constant 0 : i32
    return %arg1, %c0_i32 : i32, i32
  }
  func.func @transform_1(%arg0: i32, %arg1: i32) -> (i32, i32) {
    %c0_i32 = arith.constant 0 : i32
    %c0_i32_0 = arith.constant 0 : i32
    return %c0_i32, %arg1 : i32, i32
  }
  func.func @transform_2(%arg0: i32, %arg1: i32) -> (i32, i32) {
    %c0_i32 = arith.constant 0 : i32
    %c0_i32_0 = arith.constant 0 : i32
    %c0_i32_1 = arith.constant 0 : i32
    return %c0_i32, %c0_i32_0 : i32, i32
  }
}

</mosaic_0001>

<bundles_post_ra>
// kernel: tpu_custom_call.1
= control target key start
LH: loop header
LB: loop body
LE: loop exit
PB: predicated region body
PF: predicated region fallthrough
CT: control target
= control target key end

     0   :  { %7 = vsyncpa [#allocation5], 0  ;;  %s806_s0 = inlined_call_operand.hbm [shape: f32[16,32], index: 0, kind: input, shape index: {}]   ;;  %s807_s1 = inlined_call_operand.vmem [shape: f32[1,16], index: 1, kind: input, shape index: {}]   ;;  %s808_s2 = inlined_call_operand.hbm [shape: f32[1,1], index: 2, kind: output, shape index: {}]  }
   0x1   :  { %8 = vsyncpa [#allocation6], 0  ;;  %s695_s9 = smov 0   ;;  %s697_s10 = smov 0  }
   0x2   :  { %s699_s11 = smov 0  }
   0x3 LB: > { %s471_s12 = sadd.s32 4294967295, %s666_s11   ;;  %s26_s13 = sadd.s32 1, %s662_s10  ;;  %s666_s11 = sphi %s699_s11, %s14_s11   ;;  %s662_s10 = sphi %s697_s10, %s819_s10   ;;  %s658_s9 = sphi %s695_s9, %s818_s9  }
   0x4   : > { %p28_p0 = scmp.ge.s32.totalorder %s26_s13, 2  ;;  %p472_p1 = scmp.ge.s32.totalorder %s666_s11, 1 }
   0x5   : > { %p104_p2 = scmp.lt.s32.totalorder %s666_s11, 3  ;;  %p722_p4 = scmp.eq.s32.totalorder %s471_s12, 0 }
   0x6   : > { %s821_s13 = smov (%p28_p0, %s26_s13), 0  ;;  %s668_s16 = smov [#allocation4]  }
   0x7   : > { %p716_p3 = pnand %p472_p1, %p104_p2  ;;  %s119_s17 = sshll.u32 %s668_s16, 4  ;;  %s120_s17 = int_to_ptr.vmem [resolvable:$true] %s119_s17 }
   0x8   : > { %s813_s15 = scalar_select %p722_p4, 1, 0 }
   0x9   : > { %s812_s14 = scalar_select %p716_p3, 1, 0 }
   0xa   : > { %p530_p5 = pneg %p716_p3  ;;  %s582_s21 = scalar_lea.hbm %s806_s0, 256 }
   0xb   : > { %p583_p7 = scmp.ne.s32.totalorder %s806_s0, %s582_s21  ;;  %p589_p11 = scmp.lt.u32.totalorder %s582_s21, %s806_s0 }
   0xc   : > { %p730_p6 = pnand %p722_p4, %p530_p5 }
   0xe   : > { %p584_p8 = pneg %p730_p6 }
  0x10   : > { %p585_p9 = pnand %p584_p8, %p583_p7 }
  0x12   : > { %p586_p10 = pneg %p585_p9 }
  0x14   : > { %p591_p12 = pnand %p589_p11, %p586_p10 }
  0x16   : > { %594 = shalt.err (!%p591_p12)
}
  0x17   : > { %s595_s26 = scalar_lea.vmem %s120_s17, 256  ;;  %p603_p2 = scmp.lt.s32.totalorder %s120_s17, %s120_s17 }
  0x18   : > { %p596_p13 = scmp.ne.s32.totalorder %s120_s17, %s595_s26  ;;  %p604_p5 = scmp.lt.s32.totalorder %s595_s26, %s595_s26 }
  0x1a   : > { %p598_p0 = pnand %p596_p13, %p584_p8  ;;  %p605_p4 = por %p604_p5, %p603_p2 }
  0x1c   : > { %p599_p1 = pneg %p598_p0 }
  0x1e   : > { %p606_p3 = pnand %p605_p4, %p599_p1 }
  0x20   : > { %609 = shalt.err (!%p606_p3)
}
  0x21   : > { %s669_s27 = smov 128   ;;  %s670_s28 = smov 8  }
  0x22   : > { %533 = dma.hbm_to_vmem [thread:$0]  (!%p730_p6), %s806_s0, 256, %s120_s17, [#allocation5], %s669_s27, %s669_s27, %s670_s28  }
  0x23   : > { %p815_p7 = scmp.ne.s32.totalorder %s812_s14, 0 }
  0x24   : > { %p816_p9 = scmp.ne.s32.totalorder (!%p815_p7), %s813_s15, 0 }
  0x25   : > { %141 = sbr.rel (%p815_p7) target bundleno = 1017 (0x3f9), region = 28 }
  0x2c   : > { %649 = dma.done.wait (%p816_p9), [#allocation5], 256  }
  0x2d   : > { %651 = vsyncadd (%p816_p9), [#allocation5], 4294967040  ;;  %p160_p4 = scmp.eq.s32.totalorder %s658_s9, 0 }
  0x2e   : > { %vm166_vm0 = vcmask (%p160_p4), 253952   ;;  %v671_v0 = vmov (%p160_p4), 0.0  }
  0x2f   : > { %165 = sbr.rel (!%p160_p4) target bundleno = 54 (0x36), region = 36  ;;  %167 = vst.msk [vmem:[#allocation2] sm:$0x1] (%p160_p4), %vm166_vm0, %v671_v0 }
  0x36 PF: > { %p478_p3 = scmp.ne.s32.totalorder %s658_s9, 0 }
  0x37   : > { %v173_v1 = vld [vmem:[#allocation4] sm:$0xff] (!%p478_p3)  ;;  %v174_v2 = vld [vmem:[#allocation4 + $0x8] sm:$0xff] (!%p478_p3)  ;;  %v672_v3 = vmov (!%p478_p3), 0.0|0.0   ;;  %vm673_vm1 = vmmov (!%p478_p3), 0   ;;  %v674_v5 = vmov (!%p478_p3), 0.0   ;;  %vm175_vm2 = vcmask (!%p478_p3), 130048  }
  0x38   : > { %170 = sbr.rel (%p478_p3) target bundleno = 276 (0x114), region = 40  ;;  %511 = vmatprep.subr.bf16.mxu0 (!%p478_p3), %v672_v3  ;;  %v512_v4 = vpack.c.bf16 (!%p478_p3), %v174_v2, %v173_v1  ;;  %501 = vmatprep.mubr.msk.f32.mxu0 (!%p478_p3), %vm673_vm1, %v674_v5  ;;  %v172_v6 = vld [vmem:[%s807_s1] sm:$0x1] (!%p478_p3)  ;;  %vm250_vm3 = vcmask (!%p478_p3), 253952  }
  0x39   : > { %v171_v7 = vld [vmem:[#allocation2] sm:$0x1] (!%p478_p3) }
  0x3a   : > { %513 = vmatpush3.bf16.msra.mxu0 (!%p478_p3), %v512_v4 }
  0x3d   : > { %502 = vmatmul.mubr.msk.f32.vlgmr.msra.gmra.mrb[0].mxu0 (!%p478_p3), %vm175_vm2, %v172_v6 }
 0x110   : > { %v245_v8 = vpop.f32.mrb[0].mxu0 }
 0x111   : > { %v249_v9 = vadd.f32 %v245_v8, %v171_v7  ;;  %v503_v10 = vpop.f32.mrb[1].mxu0 }
 0x113   : > { %251 = vst.msk [vmem:[#allocation2] sm:$0x1] %vm250_vm3, %v249_v9 }
 0x114 PF: > { %p252_p6 = scmp.eq.s32.totalorder %s658_s9, 1 }
 0x115   : > { %vm259_vm4 = vcmask (%p252_p6), 253952   ;;  %vm282_vm5 = vcmask (%p252_p6), 0   ;;  %v675_v14 = vmov (%p252_p6), 0.0  }
 0x116   : > { %256 = sbr.rel (!%p252_p6) target bundleno = 522 (0x20a), region = 44  ;;  %283 = vst.msk [vmem:[#allocation3] sm:$0x1] (%p252_p6), %vm282_vm5, %v675_v14 }
 0x11a   : > { %v257_v11 = vld [vmem:[#allocation2] sm:$0x1] (%p252_p6) }
 0x11b   : > { %v258_v12 = vmul.f32 (%p252_p6), %v257_v11, %v257_v11 }
 0x11d   : > { %v260_v13 = vsel %vm259_vm4, %v258_v12, 0.0 }
 0x11e   : > { %261 = vadd.xlane.f32.xlu0 %v260_v13 }
 0x1ab   : > { %v262_v15 = vpop.xlane.xlu0 %261 }
 0x1ac   : > { %v263_v16 = vrot.slane %v262_v15, 4 }
 0x1ae   : > { %v264_v17 = vadd.f32 %v263_v16, %v262_v15 }
 0x1b0   : > { %v265_v18 = vrot.slane %v264_v17, 2 }
 0x1b2   : > { %v266_v19 = vadd.f32 %v265_v18, %v264_v17 }
 0x1b4   : > { %v267_v20 = vrot.slane %v266_v19, 1 }
 0x1b6   : > { %v268_v21 = vadd.f32 %v267_v20, %v266_v19 }
 0x1b8   : > { %518 = vpush %v268_v21 }
 0x1e9   : > { %s519_s5 = spop %518 }
 0x1ea   : > { %v270_v22 = vstv %s519_s5 }
 0x1eb   : > { %574 = vrsqrt.f32 %v270_v22  ;;  %vm273_vm6 = vcmp.eq.f32.partialorder %v270_v22, inf  ;;  %v276_v25 = vand.u32 2147483648, %v270_v22  ;;  %vm275_vm7 = vcmp.eq.f32.partialorder %v270_v22, 0.0 }
 0x1f5   : > { %v575_v23 = vpop.eup %574 }
 0x1f6   : > { %v272_v24 = vmul.f32 %v575_v23, %v270_v22 }
 0x1f8   : > { %v274_v26 = vsel %vm273_vm6, %v270_v22, %v272_v24 }
 0x1f9   : > { %v277_v27 = vsel %vm275_vm7, %v276_v25, %v274_v26 }
 0x1fa   : > { %v278_v28 = vmax.f32 %v277_v27, 1e-12 }
 0x1fc   : > { %576 = vrcp.f32 %v278_v28 }
 0x206   : > { %v577_v29 = vpop.eup %576 }
 0x207   : > { %v280_v30 = vmul.f32 %v577_v29, %v257_v11 }
 0x209   : > { %281 = vst.msk [vmem:[#allocation2] sm:$0x1] %vm259_vm4, %v280_v30 }
 0x20a PF: > { %p481_p8 = scmp.ne.s32.totalorder %s658_s9, 1 }
 0x20b   : > { %v288_v31 = vld [vmem:[#allocation4] sm:$0xff] (!%p481_p8)  ;;  %v289_v32 = vld [vmem:[#allocation4 + $0x8] sm:$0xff] (!%p481_p8)  ;;  %vm290_vm8 = vcmask (!%p481_p8), 261120   ;;  %v676_v33 = vmov (!%p481_p8), 0.0|0.0   ;;  %vm677_vm10 = vmmov (!%p481_p8), 0   ;;  %v678_v35 = vmov (!%p481_p8), 0.0  }
 0x20c   : > { %286 = sbr.rel (%p481_p8) target bundleno = 956 (0x3bc), region = 48  ;;  %514 = vmatprep.subr.bf16.mxu0 (!%p481_p8), %v676_v33  ;;  %v515_v34 = vpack.c.bf16 (!%p481_p8), %v289_v32, %v288_v31  ;;  %vm516_vm9 = vmpackc.low (!%p481_p8), %vm290_vm8, %vm290_vm8  ;;  %508 = vmatprep.mubr.msk.f32.mxu0 (!%p481_p8), %vm677_vm10, %v678_v35  ;;  %vm372_vm11 = vcmask (!%p481_p8), 122880   ;;  %v370_v48 = vld [vmem:[#allocation3] sm:$0x1] (!%p481_p8)  ;;  %vm385_vm12 = vcmask (!%p481_p8), 0  }
 0x20e   : > { %517 = vmatpush3.bf16.xpose.msk.msra.mxu0 (!%p481_p8), %vm516_vm9, %v515_v34 }
 0x210   : > { %v287_v36 = vld [vmem:[#allocation2] sm:$0x1] (!%p481_p8) }
 0x215   : > { %509 = vmatmul.mubr.msk.f32.vlgmr.msra.gmra.mrb[0].mxu0 %vm290_vm8, %v287_v36 }
 0x2e8   : > { %v366_v37 = vpop.f32.mrb[0].mxu0 }
 0x2e9   : > { %v371_v38 = vmul.f32 %v366_v37, %v366_v37  ;;  %v510_v39 = vpop.f32.mrb[1].mxu0 }
 0x2eb   : > { %v373_v40 = vsel %vm372_vm11, %v371_v38, 0.0 }
 0x2ec   : > { %374 = vadd.xlane.f32.xlu0 %v373_v40 }
 0x379   : > { %v375_v41 = vpop.xlane.xlu0 %374 }
 0x37a   : > { %v376_v42 = vrot.slane %v375_v41, 4 }
 0x37c   : > { %v377_v43 = vadd.f32 %v376_v42, %v375_v41 }
 0x37e   : > { %v378_v44 = vrot.slane %v377_v43, 2 }
 0x380   : > { %v379_v45 = vadd.f32 %v378_v44, %v377_v43 }
 0x382   : > { %v380_v46 = vrot.slane %v379_v45, 1 }
 0x384   : > { %v381_v47 = vadd.f32 %v380_v46, %v379_v45 }
 0x386   : > { %520 = vpush %v381_v47 }
 0x3b7   : > { %s521_s6 = spop %520 }
 0x3b8   : > { %v383_v49 = vstv %s521_s6 }
 0x3b9   : > { %v384_v50 = vadd.f32 %v383_v49, %v370_v48 }
 0x3bb   : > { %386 = vst.msk [vmem:[#allocation3] sm:$0x1] %vm385_vm12, %v384_v50 }
 0x3bc PF: > { %388 = sbr.rel (!%p252_p6) target bundleno = 992 (0x3e0), region = 52  ;;  %vm400_vm15 = vcmask (%p252_p6), 0  }
 0x3c2   : > { %v389_v51 = vld [vmem:[#allocation3] sm:$0x1] (%p252_p6) }
 0x3c3   : > { %578 = vrsqrt.f32 %v389_v51  ;;  %vm392_vm13 = vcmp.eq.f32.partialorder %v389_v51, inf  ;;  %v395_v53 = vand.u32 2147483648, %v389_v51  ;;  %vm394_vm14 = vcmp.eq.f32.partialorder %v389_v51, 0.0 }
 0x3cd   : > { %v579_v52 = vpop.eup %578 }
 0x3ce   : > { %v391_v54 = vmul.f32 %v579_v52, %v389_v51 }
 0x3d0   : > { %v393_v55 = vsel %vm392_vm13, %v389_v51, %v391_v54 }
 0x3d1   : > { %v396_v56 = vsel %vm394_vm14, %v395_v53, %v393_v55 }
 0x3d2   : > { %v397_v57 = vmax.f32 %v396_v56, 1e-12 }
 0x3d4   : > { %580 = vrcp.f32 %v397_v57 }
 0x3de   : > { %v581_v58 = vpop.eup %580 }
 0x3df   : > { %401 = vst.msk [vmem:[#allocation7] sm:$0x1] %vm400_vm15, %v581_v58 }
 0x3e0 PF: > { %p771_p10 = scmp.eq.s32.totalorder %s471_s12, 1  ;;  %s679_s8 = smov [#allocation7]  }
 0x3e1   : > { %s409_s9 = sshll.u32 %s679_s8, 4  ;;  %s410_s9 = int_to_ptr.vmem [resolvable:$true] %s409_s9 }
 0x3e2   : > { %s610_s14 = scalar_lea.vmem %s410_s9, 16  ;;  %s616_s15 = scalar_lea.vmem %s410_s9, 32 }
 0x3e3   : > { %p611_p11 = scmp.ne.s32.totalorder %s410_s9, %s610_s14  ;;  %p617_p0 = scmp.lt.s32.totalorder %s410_s9, %s410_s9 }
 0x3e4   : > { %p618_p1 = scmp.lt.s32.totalorder %s616_s15, %s610_s14 }
 0x3e5   : > { %p612_p12 = pnand %p611_p11, %p771_p10 }
 0x3e6   : > { %p619_p2 = por %p618_p1, %p617_p0 }
 0x3e7   : > { %p613_p13 = pneg %p612_p12 }
 0x3e9   : > { %p620_p5 = pnand %p619_p2, %p613_p13 }
 0x3eb   : > { %623 = shalt.err (!%p620_p5)
}
 0x3ec   : > { %s624_s17 = scalar_lea.hbm %s808_s2, 16 }
 0x3ed   : > { %p625_p7 = scmp.ne.s32.totalorder %s808_s2, %s624_s17  ;;  %p630_p3 = scmp.lt.u32.totalorder %s624_s17, %s808_s2 }
 0x3ef   : > { %p626_p9 = pnand %p625_p7, %p771_p10 }
 0x3f1   : > { %p627_p4 = pneg %p626_p9 }
 0x3f3   : > { %p632_p6 = pnand %p630_p3, %p627_p4 }
 0x3f5   : > { %635 = shalt.err (!%p632_p6)
}
 0x3f6   : > { %527 = dma.vmem_to_hbm [thread:$0]  (%p771_p10), %s410_s9, 16, %s808_s2, [#allocation6]  }
 0x3f7   : > { %653 = dma.done.wait (%p771_p10), [#allocation6], 16  }
 0x3f8   : > { %655 = vsyncadd (%p771_p10), [#allocation6], 4294967280 }
 0x3f9 PF: > { %s14_s11 = sadd.s32 1, %s666_s11   ;;  %s818_s9 = smov %s662_s10 }
 0x3fa   : > { %p11_p8 = scmp.ge.s32.totalorder %s14_s11, 4   ;;  %s819_s10 = smov %s821_s13 }
 0x3fc   :  { %13 = sbr.rel (!%p11_p8) target bundleno = 3 (0x3), region = 81 }
 0x403   :  { %422 = vsyncpa [#allocation5], 1 }
 0x404   :  { %424 = vsyncpa [#allocation5 + $0x1], 1 }
 0x405   :  { %425 = vsyncpa [#allocation6], 1 }
 0x406   :  { %427 = vsyncpa [#allocation6 + $0x1], 1 }

</bundles_post_ra>
